<compile_context>
chip_gen: v5e
topology: v5e:2x2
jax: 0.10.0
libtpu: 0.0.40
codegen_flags: <defaults>
</compile_context>

<pallas_src>
import functools

import jax
import jax.numpy as jnp
from jax import lax
from jax.experimental import pallas as pl
from jax.experimental.pallas import tpu as pltpu

RMS_EPS = 1e-6


def _round_up(x, m):
    return ((x + m - 1) // m) * m


def _vmem_budget():
    """(tile-picker budget, scoped vmem limit) derived from the chip generation."""
    try:
        cap = pltpu.get_tpu_info().vmem_capacity_bytes
    except Exception:
        cap = 64 * 1024 * 1024  # conservative default (v7x per-TC)
    return int(cap * 0.60), int(cap * 0.75)


def _pick_tiles(M, V, H, x_bytes, budget):
    """Row tile as large as possible (weight HBM traffic ~ 1/tm), then the vocab
    tile that minimizes padding (ties -> larger tile)."""
    m_cap = min(1024, _round_up(max(M, 8), 8))
    v_cap = min(4096, _round_up(max(V, 128), 128))

    def footprint(tm, tv):
        k1 = (2 * tm * H * x_bytes      # x double buffer
              + 2 * H * x_bytes         # gain
              + 2 * tv * H * 2          # bf16 weight tile double buffer
              + 2 * tm * tv * 2         # bf16 p tile double buffer
              + tm * H * 2              # resident normalized-rows scratch
              + 8 * tm * 4)             # row stats blocks
        k2 = (2 * tm * tv * 2           # p in
              + 2 * tm * tv * x_bytes   # probs out
              + 8 * tm * 4)
        return max(k1, k2)

    tm_cands = sorted({t for t in (1024, 512, 256, 128, 64, 32, 16, 8, m_cap)
                       if 8 <= t <= m_cap}, reverse=True)
    tv_cands = sorted({t for t in (4096, 2048, 1024, 512, 256, 128, v_cap)
                       if 128 <= t <= v_cap}, reverse=True)
    for tm in tm_cands:
        fitting = [tv for tv in tv_cands if footprint(tm, tv) <= budget]
        if fitting:
            tv = min(fitting, key=lambda t: (_round_up(V, t), -t))
            return tm, tv
    return tm_cands[-1], tv_cands[-1]


# --------------------------------------------------------------------------
# Kernel 1: fused RMSNorm + lm_head matmul (bf16 MXU operands, f32 accumulate)
#           + online softmax statistics over the tiled vocab axis.
# Outputs: bf16 p = exp(logit - running_max)   [Mp, Vp]
#          f32 running-max snapshot per tile   [nj, Mp, 1]
#          f32 final row max                   [Mp, 1]
#          f32 softmax denominator             [Mp, 1]
# m/l accumulate directly in their resident output blocks (same block index
# across the vocab axis), so no scratch stats and no epilogue copy.
# --------------------------------------------------------------------------
def _proj_stats_kernel(x_ref, g_ref, w_ref,
                       p_ref, msnap_ref, m_ref, l_ref,
                       xn_ref, *, v_real, tv):
    j = pl.program_id(1)

    # RMSNorm once per row tile. f32 math on the VPU (v5e has no bf16 VPU/EUP);
    # the normalized rows stay resident in a bf16 scratch across all vocab tiles.
    @pl.when(j == 0)
    def _():
        x = x_ref[...].astype(jnp.float32)
        ms = jnp.mean(x * x, axis=-1, keepdims=True)
        xn = x * lax.rsqrt(ms + RMS_EPS) * g_ref[...].astype(jnp.float32)
        xn_ref[...] = xn.astype(jnp.bfloat16)
        m_ref[...] = jnp.full(m_ref.shape, -jnp.inf, dtype=m_ref.dtype)
        l_ref[...] = jnp.zeros(l_ref.shape, dtype=l_ref.dtype)

    # Plain [tm,H] x [H,tv] NN matmul: bf16 operands, f32 accumulation on the MXU.
    logits = jnp.dot(xn_ref[...], w_ref[...], preferred_element_type=jnp.float32)

    # Mask padded vocab columns (emitted only when V was padded to a tile multiple).
    if v_real % tv != 0:
        col = j * tv + lax.broadcasted_iota(jnp.int32, logits.shape, 1)
        logits = jnp.where(col < v_real, logits, -jnp.inf)

    # Online softmax: running max + rescaled denominator (f32).
    m_prev = m_ref[...]
    m_new = jnp.maximum(m_prev, jnp.max(logits, axis=-1, keepdims=True))
    p = jnp.exp(logits - m_new)                                  # in [0, 1]
    l_ref[...] = l_ref[...] * jnp.exp(m_prev - m_new) + jnp.sum(p, axis=-1, keepdims=True)
    m_ref[...] = m_new
    msnap_ref[0] = m_new                                         # snapshot for pass 2
    p_ref[...] = p.astype(jnp.bfloat16)                          # halve the HBM round trip


# --------------------------------------------------------------------------
# Kernel 2: probs = p * exp(m_snapshot - m_final) / l
# Pure HBM-bound scale-multiply; exact reciprocal still lands on the EUP (free).
# --------------------------------------------------------------------------
def _normalize_kernel(p_ref, msnap_ref, m_ref, l_ref, o_ref):
    inv_l = pl.reciprocal(l_ref[...], approx=False)
    scale = jnp.exp(msnap_ref[0] - m_ref[...]) * inv_l           # (tm, 1)
    o_ref[...] = (p_ref[...].astype(jnp.float32) * scale).astype(o_ref.dtype)


# --------------------------------------------------------------------------
# Wrapper (forward pass of HeadProjector)
# --------------------------------------------------------------------------
def head_projector(x, norm_weight, head_weight, *, tm=None, tv=None):
    """x: [B, S, H]; norm_weight: [H]; head_weight: [V, H] (PyTorch Linear layout).

    For production, pass x/norm_weight in bf16 and store the lm_head weight
    pre-transposed in bf16 ([H, V]) so the one-time wrapper cast/transpose
    disappears; the kernel itself is dtype-agnostic on x.
    """
    B, S, H = x.shape
    V = head_weight.shape[0]
    M = B * S
    x_bytes = jnp.dtype(x.dtype).itemsize

    budget, vmem_limit = _vmem_budget()
    if tm is None or tv is None:
        ptm, ptv = _pick_tiles(M, V, H, x_bytes, budget)
        tm = ptm if tm is None else tm
        tv = ptv if tv is None else tv

    Mp = _round_up(M, tm)
    Vp = _round_up(V, tv)
    nj = Vp // tv
    grid = (Mp // tm, Vp // tv)

    x2d = x.reshape(M, H)
    if Mp != M:
        x2d = jnp.pad(x2d, ((0, Mp - M), (0, 0)))
    g2d = norm_weight.reshape(1, H)

    # One-time bf16 cast + transpose outside the hot loop (store it this way upstream).
    w = head_weight.astype(jnp.bfloat16).T                       # [H, V]
    if Vp != V:
        w = jnp.pad(w, ((0, 0), (0, Vp - V)))

    kernel1 = functools.partial(_proj_stats_kernel, v_real=V, tv=tv)

    p, m_snap, row_max, row_den = pl.pallas_call(
        kernel1,
        out_shape=(
            jax.ShapeDtypeStruct((Mp, Vp), jnp.bfloat16),   # p = exp(logit - running max)
            jax.ShapeDtypeStruct((nj, Mp, 1), jnp.float32),  # running-max snapshot per tile
            jax.ShapeDtypeStruct((Mp, 1), jnp.float32),      # final row max
            jax.ShapeDtypeStruct((Mp, 1), jnp.float32),      # softmax denominator
        ),
        grid_spec=pltpu.PrefetchScalarGridSpec(
            num_scalar_prefetch=0,
            grid=grid,
            in_specs=[
                pl.BlockSpec((tm, H), lambda i, j: (i, 0)),   # x rows (resident over j)
                pl.BlockSpec((1, H), lambda i, j: (0, 0)),    # RMSNorm gain
                pl.BlockSpec((H, tv), lambda i, j: (0, j)),   # streamed bf16 weight tile
            ],
            out_specs=[
                pl.BlockSpec((tm, tv), lambda i, j: (i, j)),      # p
                pl.BlockSpec((1, tm, 1), lambda i, j: (j, i, 0)),  # max snapshot
                pl.BlockSpec((tm, 1), lambda i, j: (i, 0)),        # row max (resident over j)
                pl.BlockSpec((tm, 1), lambda i, j: (i, 0)),        # row denom (resident over j)
            ],
            scratch_shapes=[
                pltpu.VMEM((tm, H), jnp.bfloat16),   # normalized rows (bf16 MXU operand)
            ],
        ),
        compiler_params=pltpu.CompilerParams(
            dimension_semantics=("parallel", "arbitrary"),
            vmem_limit_bytes=vmem_limit),
    )(x2d, g2d, w)

    probs = pl.pallas_call(
        _normalize_kernel,
        out_shape=jax.ShapeDtypeStruct((Mp, Vp), x.dtype),
        grid_spec=pltpu.PrefetchScalarGridSpec(
            num_scalar_prefetch=0,
            grid=grid,
            in_specs=[
                pl.BlockSpec((tm, tv), lambda i, j: (i, j)),
                pl.BlockSpec((1, tm, 1), lambda i, j: (j, i, 0)),
                pl.BlockSpec((tm, 1), lambda i, j: (i, 0)),
                pl.BlockSpec((tm, 1), lambda i, j: (i, 0)),
            ],
            out_specs=pl.BlockSpec((tm, tv), lambda i, j: (i, j)),
        ),
        compiler_params=pltpu.CompilerParams(
            dimension_semantics=("parallel", "parallel"),
            vmem_limit_bytes=vmem_limit),
    )(p, m_snap, row_max, row_den)

    return probs[:M, :V].reshape(B, S, V)


# --------------------------------------------------------------------------
# Pure-JAX reference (matches the PyTorch module in f32)
# --------------------------------------------------------------------------
def head_projector_ref(x, norm_weight, head_weight):
    xf = x.astype(jnp.float32)
    ms = jnp.mean(xf * xf, axis=-1, keepdims=True)
    xn = xf * lax.rsqrt(ms + RMS_EPS) * norm_weight.astype(jnp.float32)
    logits = xn @ head_weight.astype(jnp.float32).T
    return jax.nn.softmax(logits, axis=-1)


if __name__ == "__main__":
    key = jax.random.PRNGKey(0)

    # ---- case 1: tile-aligned shapes ------------------------------------
    B, S, H, V = 2, 8, 32, 256
    k_x, k_g, k_w = jax.random.split(key, 3)
    x = jax.random.normal(k_x, (B, S, H), dtype=jnp.float32)
    norm_weight = 1.0 + 0.1 * jax.random.normal(k_g, (H,), dtype=jnp.float32)
    head_weight = 0.05 * jax.random.normal(k_w, (V, H), dtype=jnp.float32)  # PyTorch [out, in]

    out = jax.block_until_ready(head_projector(x, norm_weight, head_weight))
    ref = head_projector_ref(x, norm_weight, head_weight)
    assert out.shape == (B, S, V)
    assert jnp.allclose(out, ref, atol=2e-3, rtol=2e-2), float(jnp.max(jnp.abs(out - ref)))
    assert jnp.allclose(jnp.sum(out, axis=-1), 1.0, atol=5e-3)

    # ---- case 2: non-divisible rows / vocab (padding + masking path) ----
    B2, S2, H2, V2 = 1, 5, 32, 200
    k_x2, k_w2 = jax.random.split(k_x, 2)
    x2 = jax.random.normal(k_x2, (B2, S2, H2), dtype=jnp.float32)
    w2 = 0.05 * jax.random.normal(k_w2, (V2, H2), dtype=jnp.float32)

    out2 = jax.block_until_ready(head_projector(x2, norm_weight, w2))
    ref2 = head_projector_ref(x2, norm_weight, w2)
    assert out2.shape == (B2, S2, V2)
    assert jnp.allclose(out2, ref2, atol=2e-3, rtol=2e-2), float(jnp.max(jnp.abs(out2 - ref2)))
    assert jnp.allclose(jnp.sum(out2, axis=-1), 1.0, atol=5e-3)

    print("KERNEL_OK")
</pallas_src>

<mosaic_0001>
module attributes {stable_mosaic.version = 11 : i64} {
  func.func @_proj_stats_kernel(%arg0: i32, %arg1: i32, %arg2: memref<16x32xf32, #tpu.memory_space<vmem>>, %arg3: memref<1x32xf32, #tpu.memory_space<vmem>>, %arg4: memref<32x256xbf16, #tpu.memory_space<vmem>>, %arg5: memref<16x256xbf16, #tpu.memory_space<vmem>>, %arg6: memref<1x16x1xf32, #tpu.memory_space<vmem>>, %arg7: memref<16x1xf32, #tpu.memory_space<vmem>>, %arg8: memref<16x1xf32, #tpu.memory_space<vmem>>, %arg9: memref<16x32xbf16, #tpu.memory_space<vmem>>) attributes {dimension_semantics = [#tpu.dimension_semantics<parallel>, #tpu.dimension_semantics<arbitrary>], iteration_bounds = array<i64: 1, 1>, scalar_prefetch = 0 : i64, scratch_operands = 1 : i64, tpu.core_type = #tpu.core_type<tc>, window_params = [{transform_indices = @transform_0, window_bounds = array<i64: 16, 32>}, {pipeline_mode = #tpu.pipeline_mode<synchronous>, transform_indices = @transform_1, window_bounds = array<i64: 1, 32>}, {transform_indices = @transform_2, window_bounds = array<i64: 32, 256>}, {transform_indices = @transform_3, window_bounds = array<i64: 16, 256>}, {transform_indices = @transform_4, window_bounds = array<i64: 1, 16, 1>}, {transform_indices = @transform_5, window_bounds = array<i64: 16, 1>}, {transform_indices = @transform_6, window_bounds = array<i64: 16, 1>}]} {
    %c0_i32 = arith.constant 0 : i32
    %0 = arith.cmpi eq, %arg1, %c0_i32 : i32
    %1 = arith.extui %0 : i1 to i32
    %c0_i32_0 = arith.constant 0 : i32
    %2 = arith.cmpi ne, %1, %c0_i32_0 : i32
    scf.if %2 {
      %c0_19 = arith.constant 0 : index
      %c0_20 = arith.constant 0 : index
      %27 = vector.load %arg2[%c0_19, %c0_20] : memref<16x32xf32, #tpu.memory_space<vmem>>, vector<16x32xf32>
      %28 = arith.mulf %27, %27 : vector<16x32xf32>
      %cst_21 = arith.constant dense<0.000000e+00> : vector<16xf32>
      %29 = vector.multi_reduction <add>, %28, %cst_21 [1] : vector<16x32xf32> to vector<16xf32>
      %30 = vector.shape_cast %29 : vector<16xf32> to vector<16x1xf32>
      %cst_22 = arith.constant 3.200000e+01 : f32
      %31 = vector.broadcast %cst_22 : f32 to vector<16x1xf32>
      %32 = arith.divf %30, %31 : vector<16x1xf32>
      %cst_23 = arith.constant 9.99999997E-7 : f32
      %33 = vector.broadcast %cst_23 : f32 to vector<16x1xf32>
      %34 = arith.addf %32, %33 : vector<16x1xf32>
      %35 = math.rsqrt %34 : vector<16x1xf32>
      %36 = vector.broadcast %35 : vector<16x1xf32> to vector<16x32xf32>
      %37 = arith.mulf %27, %36 : vector<16x32xf32>
      %c0_24 = arith.constant 0 : index
      %c0_25 = arith.constant 0 : index
      %38 = vector.load %arg3[%c0_24, %c0_25] : memref<1x32xf32, #tpu.memory_space<vmem>>, vector<1x32xf32>
      %39 = vector.broadcast %38 : vector<1x32xf32> to vector<16x32xf32>
      %40 = arith.mulf %37, %39 : vector<16x32xf32>
      %41 = arith.truncf %40 : vector<16x32xf32> to vector<16x32xbf16>
      %c0_26 = arith.constant 0 : index
      %c0_27 = arith.constant 0 : index
      %42 = vector.load %arg9[%c0_26, %c0_27] : memref<16x32xbf16, #tpu.memory_space<vmem>>, vector<16x32xbf16>
      tpu.vector_store %arg9[%c0_26, %c0_27], %41 {strides = array<i32>} : memref<16x32xbf16, #tpu.memory_space<vmem>>, vector<16x32xbf16>,
      %cst_28 = arith.constant 0xFF800000 : f32
      %43 = vector.broadcast %cst_28 : f32 to vector<16x1xf32>
      %c0_29 = arith.constant 0 : index
      %c0_30 = arith.constant 0 : index
      %44 = vector.load %arg7[%c0_29, %c0_30] : memref<16x1xf32, #tpu.memory_space<vmem>>, vector<16x1xf32>
      tpu.vector_store %arg7[%c0_29, %c0_30], %43 {strides = array<i32>} : memref<16x1xf32, #tpu.memory_space<vmem>>, vector<16x1xf32>,
      %cst_31 = arith.constant 0.000000e+00 : f32
      %45 = vector.broadcast %cst_31 : f32 to vector<16x1xf32>
      %c0_32 = arith.constant 0 : index
      %c0_33 = arith.constant 0 : index
      %46 = vector.load %arg8[%c0_32, %c0_33] : memref<16x1xf32, #tpu.memory_space<vmem>>, vector<16x1xf32>
      tpu.vector_store %arg8[%c0_32, %c0_33], %45 {strides = array<i32>} : memref<16x1xf32, #tpu.memory_space<vmem>>, vector<16x1xf32>,
    } else {
    }
    %c0 = arith.constant 0 : index
    %c0_1 = arith.constant 0 : index
    %3 = vector.load %arg9[%c0, %c0_1] : memref<16x32xbf16, #tpu.memory_space<vmem>>, vector<16x32xbf16>
    %c0_2 = arith.constant 0 : index
    %c0_3 = arith.constant 0 : index
    %4 = vector.load %arg4[%c0_2, %c0_3] : memref<32x256xbf16, #tpu.memory_space<vmem>>, vector<32x256xbf16>
    %cst = arith.constant dense<0.000000e+00> : vector<16x256xf32>
    %5 = tpu.matmul %3, %4, %cst {dimension_numbers = #tpu.dot_dimension_numbers<[1], [0], [0], [1], [0, 0, 1, 1], [], []>} : vector<16x32xbf16>, vector<32x256xbf16>, vector<16x256xf32> -> vector<16x256xf32>
    %c0_4 = arith.constant 0 : index
    %c0_5 = arith.constant 0 : index
    %6 = vector.load %arg7[%c0_4, %c0_5] : memref<16x1xf32, #tpu.memory_space<vmem>>, vector<16x1xf32>
    %cst_6 = arith.constant dense<0xFF800000> : vector<16xf32>
    %7 = vector.multi_reduction <maximumf>, %5, %cst_6 [1] : vector<16x256xf32> to vector<16xf32>
    %8 = vector.shape_cast %7 : vector<16xf32> to vector<16x1xf32>
    %9 = arith.maximumf %6, %8 : vector<16x1xf32>
    %10 = vector.broadcast %9 : vector<16x1xf32> to vector<16x256xf32>
    %11 = arith.subf %5, %10 : vector<16x256xf32>
    %12 = math.exp %11 : vector<16x256xf32>
    %c0_7 = arith.constant 0 : index
    %c0_8 = arith.constant 0 : index
    %13 = vector.load %arg8[%c0_7, %c0_8] : memref<16x1xf32, #tpu.memory_space<vmem>>, vector<16x1xf32>
    %14 = arith.subf %6, %9 : vector<16x1xf32>
    %15 = math.exp %14 : vector<16x1xf32>
    %16 = arith.mulf %13, %15 : vector<16x1xf32>
    %cst_9 = arith.constant dense<0.000000e+00> : vector<16xf32>
    %17 = vector.multi_reduction <add>, %12, %cst_9 [1] : vector<16x256xf32> to vector<16xf32>
    %18 = vector.shape_cast %17 : vector<16xf32> to vector<16x1xf32>
    %19 = arith.addf %16, %18 : vector<16x1xf32>
    %c0_10 = arith.constant 0 : index
    %c0_11 = arith.constant 0 : index
    %20 = vector.load %arg8[%c0_10, %c0_11] : memref<16x1xf32, #tpu.memory_space<vmem>>, vector<16x1xf32>
    tpu.vector_store %arg8[%c0_10, %c0_11], %19 {strides = array<i32>} : memref<16x1xf32, #tpu.memory_space<vmem>>, vector<16x1xf32>,
    %c0_12 = arith.constant 0 : index
    %c0_13 = arith.constant 0 : index
    %21 = vector.load %arg7[%c0_12, %c0_13] : memref<16x1xf32, #tpu.memory_space<vmem>>, vector<16x1xf32>
    tpu.vector_store %arg7[%c0_12, %c0_13], %9 {strides = array<i32>} : memref<16x1xf32, #tpu.memory_space<vmem>>, vector<16x1xf32>,
    %c0_14 = arith.constant 0 : index
    %c0_15 = arith.constant 0 : index
    %c0_16 = arith.constant 0 : index
    %22 = vector.load %arg6[%c0_14, %c0_15, %c0_16] : memref<1x16x1xf32, #tpu.memory_space<vmem>>, vector<1x16x1xf32>
    %23 = vector.shape_cast %22 : vector<1x16x1xf32> to vector<16x1xf32>
    %24 = vector.shape_cast %9 : vector<16x1xf32> to vector<1x16x1xf32>
    tpu.vector_store %arg6[%c0_14, %c0_15, %c0_16], %24 {strides = array<i32>} : memref<1x16x1xf32, #tpu.memory_space<vmem>>, vector<1x16x1xf32>,
    %25 = arith.truncf %12 : vector<16x256xf32> to vector<16x256xbf16>
    %c0_17 = arith.constant 0 : index
    %c0_18 = arith.constant 0 : index
    %26 = vector.load %arg5[%c0_17, %c0_18] : memref<16x256xbf16, #tpu.memory_space<vmem>>, vector<16x256xbf16>
    tpu.vector_store %arg5[%c0_17, %c0_18], %25 {strides = array<i32>} : memref<16x256xbf16, #tpu.memory_space<vmem>>, vector<16x256xbf16>,
    return
  }
  func.func @transform_0(%arg0: i32, %arg1: i32) -> (i32, i32) {
    %c0_i32 = arith.constant 0 : i32
    %c0_i32_0 = arith.constant 0 : i32
    return %arg0, %c0_i32 : i32, i32
  }
  func.func @transform_1(%arg0: i32, %arg1: i32) -> (i32, i32) {
    %c0_i32 = arith.constant 0 : i32
    %c0_i32_0 = arith.constant 0 : i32
    %c0_i32_1 = arith.constant 0 : i32
    return %c0_i32, %c0_i32_0 : i32, i32
  }
  func.func @transform_2(%arg0: i32, %arg1: i32) -> (i32, i32) {
    %c0_i32 = arith.constant 0 : i32
    %c0_i32_0 = arith.constant 0 : i32
    return %c0_i32, %arg1 : i32, i32
  }
  func.func @transform_3(%arg0: i32, %arg1: i32) -> (i32, i32) {
    %c0_i32 = arith.constant 0 : i32
    return %arg0, %arg1 : i32, i32
  }
  func.func @transform_4(%arg0: i32, %arg1: i32) -> (i32, i32, i32) {
    %c0_i32 = arith.constant 0 : i32
    %c0_i32_0 = arith.constant 0 : i32
    return %arg1, %arg0, %c0_i32 : i32, i32, i32
  }
  func.func @transform_5(%arg0: i32, %arg1: i32) -> (i32, i32) {
    %c0_i32 = arith.constant 0 : i32
    %c0_i32_0 = arith.constant 0 : i32
    return %arg0, %c0_i32 : i32, i32
  }
  func.func @transform_6(%arg0: i32, %arg1: i32) -> (i32, i32) {
    %c0_i32 = arith.constant 0 : i32
    %c0_i32_0 = arith.constant 0 : i32
    return %arg0, %c0_i32 : i32, i32
  }
}

</mosaic_0001>

<bundles_post_ra>
// kernel: tpu_custom_call.1
= control target key start
LH: loop header
LB: loop body
LE: loop exit
PB: predicated region body
PF: predicated region fallthrough
CT: control target
= control target key end

     0   :  { %12 = vsyncpa [#allocation4], 0  ;;  %s572_s0 = inlined_call_operand.hbm [shape: f32[16,32], index: 0, kind: input, shape index: {}]   ;;  %s573_s1 = inlined_call_operand.hbm [shape: f32[1,32], index: 1, kind: input, shape index: {}]   ;;  %s574_s2 = inlined_call_operand.hbm [shape: bf16[32,256], index: 2, kind: input, shape index: {}]   ;;  %s575_s3 = inlined_call_operand.hbm [shape: bf16[16,256], index: 3, kind: output, shape index: {0}]   ;;  %s576_s4 = inlined_call_operand.vmem [shape: f32[1,16,1], index: 4, kind: output, shape index: {1}]   ;;  %s577_s5 = inlined_call_operand.vmem [shape: f32[16,1], index: 5, kind: output, shape index: {2}]   ;;  %s578_s6 = inlined_call_operand.vmem [shape: f32[16,1], index: 6, kind: output, shape index: {3}]  }
   0x1   :  { %13 = vsyncpa [#allocation7], 0  ;;  %s33_s23 = sshll.u32 %s573_s1, 4  ;;  %s34_s23 = int_to_ptr.hbm [resolvable:$true] %s33_s23 }
   0x2   :  { %14 = vsyncpa [#allocation5], 0  ;;  %s445_s24 = smov [#allocation6]   ;;  %s19_s28 = sshll.u32 %s572_s0, 4  ;;  %s20_s28 = int_to_ptr.hbm [resolvable:$true] %s19_s28 }
   0x3   :  { %s35_s25 = sshll.u32 %s445_s24, 4  ;;  %s446_s29 = smov [#allocation3]   ;;  %s36_s25 = int_to_ptr.vmem [resolvable:$true] %s35_s25 }
   0x4   :  { %38 = dma.hbm_to_vmem [thread:$0]  %s34_s23, 16, %s36_s25, [#allocation7]  }
   0x5   :  { %s21_s30 = sshll.u32 %s446_s29, 4  ;;  %s447_s7 = smov 128   ;;  %s22_s30 = int_to_ptr.vmem [resolvable:$true] %s21_s30 }
   0x6   :  { %s448_s8 = smov 8   ;;  %s43_s10 = sshll.u32 %s574_s2, 4  ;;  %s44_s10 = int_to_ptr.hbm [resolvable:$true] %s43_s10 }
   0x7   :  { %27 = dma.hbm_to_vmem [thread:$0]  %s20_s28, 256, %s22_s30, [#allocation4], %s447_s7, %s447_s7, %s448_s8  }
   0x8   :  { %s449_s11 = smov [#allocation8]  }
   0x9   :  { %s45_s12 = sshll.u32 %s449_s11, 4  ;;  %s46_s12 = int_to_ptr.vmem [resolvable:$true] %s45_s12 }
   0xa   :  { %51 = dma.hbm_to_vmem [thread:$0]  %s44_s10, 512, %s46_s12, [#allocation7], %s447_s7, %s447_s7, %s448_s8  }
   0xb   :  { %439 = dma.done.wait [#allocation4], 256  }
   0xc   :  { %440 = vsyncadd [#allocation4], 4294967040 }
   0xd   :  { %441 = dma.done.wait [#allocation7], 528  }
   0xe   :  { %442 = vsyncadd [#allocation7], 4294966768  ;;  %v69_v0 = vld [vmem:[#allocation3] sm:$0xff]  ;;  %vm73_vm0 = vcmask 261120   ;;  %v505_v2 = vld [vmem:[#allocation3 + $0x8] sm:$0xff]  ;;  %v450_v6 = vmov 32.0  }
   0xf   :  { %v71_v1 = vmul.f32 %v69_v0, %v69_v0  ;;  %v72_v4 = vmul.f32 %v505_v2, %v505_v2  ;;  %325 = vrcp.f32 %v450_v6  ;;  %v299_v16 = vld [vmem:[#allocation8 + $0x10] sm:$0xf]  ;;  %v311_v17 = vld [vmem:[#allocation8 + $0x14] sm:$0xf0]  ;;  %v310_v18 = vld [vmem:[#allocation8 + $0x14] sm:$0xf] }
  0x10   :  { %v300_v19 = vor.u32 %v311_v17, %v299_v16  ;;  %v301_v20 = vld [vmem:[#allocation8 + $0x18] sm:$0xf0]  ;;  %v291_v21 = vld [vmem:[#allocation8] sm:$0xf]  ;;  %v309_v22 = vld [vmem:[#allocation8 + $0x4] sm:$0xf0] }
  0x11   :  { %v74_v3 = vsel %vm73_vm0, %v71_v1, 0.0  ;;  %v77_v5 = vsel %vm73_vm0, %v72_v4, 0.0  ;;  %v304_v23 = vor.u32 %v310_v18, %v301_v20  ;;  %v308_v24 = vld [vmem:[#allocation8 + $0x4] sm:$0xf]  ;;  %v293_v25 = vld [vmem:[#allocation8 + $0x8] sm:$0xf0]  ;;  %v292_v26 = vor.u32 %v309_v22, %v291_v21 }
  0x12   :  { %75 = vadd.xlane.f32.xlu0 %v74_v3  ;;  %170 = vmatpush.bf16.msra.mxu0 %v300_v19  ;;  %v296_v28 = vor.u32 %v308_v24, %v293_v25  ;;  %v324_v39 = vld [vmem:[#allocation6] ss:$0 sm:$0xff]  ;;  %vm121_vm5 = vcmask 257024   ;;  %vm124_vm9 = vcmask 7168   ;;  %v451_v53 = vmov -inf   ;;  %s259_s10 = sshll.u32 %s575_s3, 4  ;;  %s260_s10 = int_to_ptr.hbm [resolvable:$true] %s259_s10 }
  0x13   :  { %184 = vmatpush.bf16.msra.mxu1 %v304_v23  ;;  %125 = vst.msk [vmem:[%s577_s5] sm:$0xff] %vm124_vm9, %v451_v53  ;;  %v452_v60 = vmov 0   ;;  %v453_v61 = vmov 0.0  }
  0x14   :  { %126 = vst.msk [vmem:[%s577_s5 + $0x8] sm:$0xff] %vm124_vm9, %v451_v53  ;;  %322 = vset.pattern.permute.xlu2 %v452_v60  ;;  %323 = vset.pattern.permute.xlu0 %v452_v60 }
  0x15   :  { %v326_v7 = vpop.eup %325  ;;  %127 = vst.msk [vmem:[%s578_s6] sm:$0xff] %vm124_vm9, %v453_v61 }
  0x16   :  { %v81_v8 = vmul.f32 32.0, %v326_v7  ;;  %vm85_vm1 = vweird.f32 %v326_v7  ;;  %171 = vmatpush.bf16.msra.mxu0 %v292_v26  ;;  %128 = vst.msk [vmem:[%s578_s6 + $0x8] sm:$0xff] %vm124_vm9, %v453_v61 }
  0x17   :  { %185 = vmatpush.bf16.msra.mxu1 %v296_v28 }
  0x18   :  { %v82_v9 = vsub.f32 1.0, %v81_v8 }
  0x1a   :  { %78 = vadd.xlane.f32.xlu0 %v77_v5  ;;  %v83_v10 = vmul.f32 %v326_v7, %v82_v9  ;;  %v192_v62 = vld [vmem:[%s577_s5] sm:$0xff] }
  0x1c   :  { %v84_v11 = vadd.f32 %v326_v7, %v83_v10 }
  0x1e   :  { %v86_v12 = vsel %vm85_vm1, %v326_v7, %v84_v11 }
  0x85   :  { %v76_v13 = vpop.xlane.xlu0 %75 }
  0x86   :  { %v87_v14 = vmul.f32 %v86_v12, %v76_v13 }
  0x88   :  { %v89_v15 = vadd.f32 1e-06, %v87_v14 }
  0x8a   :  { %327 = vrsqrt.f32 %v89_v15  ;;  %vm97_vm3 = vweird.f32 %v89_v15 }
  0x8d   :  { %v79_v27 = vpop.xlane.xlu0 %78 }
  0x8e   :  { %v88_v29 = vmul.f32 %v86_v12, %v79_v27  ;;  %v224_v27 = vld [vmem:[%s578_s6] sm:$0xff] }
  0x90   :  { %v328_v30 = vpop.eup %327  ;;  %v90_v31 = vadd.f32 1e-06, %v88_v29 }
  0x91   :  { %v92_v32 = vmul.f32 %v328_v30, %v89_v15  ;;  %vm98_vm2 = vweird.f32 %v328_v30 }
  0x92   :  { %329 = vrsqrt.f32 %v90_v31  ;;  %vm99_vm4 = vmor %vm97_vm3, %vm98_vm2  ;;  %vm107_vm7 = vweird.f32 %v90_v31 }
  0x93   :  { %v93_v33 = vmul.f32 %v328_v30, %v92_v32  ;;  %v225_v32 = vld [vmem:[%s578_s6 + $0x8] sm:$0xff] }
  0x95   :  { %v94_v34 = vmul.f32 0.5, %v93_v33 }
  0x97   :  { %v95_v35 = vsub.f32 1.5, %v94_v34 }
  0x98   :  { %v330_v36 = vpop.eup %329 }
  0x99   :  { %v96_v37 = vmul.f32 %v328_v30, %v95_v35  ;;  %v102_v38 = vmul.f32 %v330_v36, %v90_v31  ;;  %vm108_vm6 = vweird.f32 %v330_v36 }
  0x9a   :  { %vm109_vm8 = vmor %vm107_vm7, %vm108_vm6 }
  0x9b   :  { %v100_v40 = vsel %vm99_vm4, %v328_v30, %v96_v37  ;;  %v103_v41 = vmul.f32 %v330_v36, %v102_v38 }
  0x9c   :  { %v111_v42 = vmul.f32 %v100_v40, %v69_v0 }
  0x9d   :  { %v104_v43 = vmul.f32 0.5, %v103_v41 }
  0x9e   :  { %v117_v44 = vmul.f32 %v324_v39, %v111_v42 }
  0x9f   :  { %v105_v45 = vsub.f32 1.5, %v104_v43 }
  0xa0   :  { %v119_v46 = vpack.c.bf16 %v117_v44, %v117_v44 }
  0xa1   :  { %v106_v47 = vmul.f32 %v330_v36, %v105_v45 }
  0xa2   :  { %122 = vst.msk [vmem:[#allocation2] sm:$0xf] %vm121_vm5, %v119_v46 }
  0xa3   :  { %v110_v48 = vsel %vm109_vm8, %v330_v36, %v106_v47 }
  0xa4   :  { %v112_v49 = vmul.f32 %v110_v48, %v505_v2  ;;  %v193_v2 = vld [vmem:[%s577_s5 + $0x8] sm:$0xff] }
  0xa6   :  { %v118_v50 = vmul.f32 %v324_v39, %v112_v49 }
  0xa8   :  { %v120_v51 = vpack.c.bf16 %v118_v50, %v118_v50 }
  0xaa   :  { %123 = vst.msk [vmem:[#allocation2 + $0x4] sm:$0xf] %vm121_vm5, %v120_v51 }
  0xb1   :  { %v307_v52 = vld [vmem:[#allocation2] sm:$0xff] }
  0xb2   :  { %305 = vmatmul.msk.bf16.vlgmr.msra.gmra.mxu0 %vm73_vm0, %v307_v52  ;;  %306 = vmatmul.msk.bf16.vlgmr.msra.gmra.mxu1 %vm73_vm0, %v307_v52 }
 0x12f   :  { %v173_v54 = vpop.f32.mrf.mxu0  ;;  %v187_v55 = vpop.f32.mrf.mxu1 }
 0x130   :  { %v194_v56 = vmax.f32 %v173_v54, %v187_v55 }
 0x132   :  { %195 = vmax.xlane.f32.xlu1 %v194_v56 }
 0x137   :  { %v175_v57 = vpop.f32.mrf.mxu0  ;;  %v189_v58 = vpop.f32.mrf.mxu1 }
 0x138   :  { %v197_v59 = vmax.f32 %v175_v57, %v189_v58 }
 0x13a   :  { %198 = vmax.xlane.f32.xlu1 %v197_v59 }
 0x1a5   :  { %v196_v63 = vpop.xlane.xlu1 %195 }
 0x1a6   :  { %v200_v0 = vmax.f32 %v192_v62, %v196_v63 }
 0x1a8   :  { %v226_v1 = vsub.f32 %v192_v62, %v200_v0  ;;  %245 = vst.msk [vmem:[%s577_s5] sm:$0xff] %vm124_vm9, %v200_v0  ;;  %204 = vperm.xlu2 %322, %v200_v0  }
 0x1a9   :  { %247 = vst.msk [vmem:[%s576_s4] sm:$0xff] %vm124_vm9, %v200_v0 }
 0x1aa   :  { %v228_v24 = vmul.f32 1.442695, %v226_v1 }
 0x1ad   :  { %v199_v3 = vpop.xlane.xlu1 %198 }
 0x1ae   :  { %v201_v4 = vmax.f32 %v193_v2, %v199_v3 }
 0x1b0   :  { %v227_v5 = vsub.f32 %v193_v2, %v201_v4  ;;  %246 = vst.msk [vmem:[%s577_s5 + $0x8] sm:$0xff] %vm124_vm9, %v201_v4  ;;  %209 = vperm.xlu2 %322, %v201_v4  }
 0x1b1   :  { %248 = vst.msk [vmem:[%s576_s4 + $0x8] sm:$0xff] %vm124_vm9, %v201_v4  ;;  %s454_s4 = smov [#allocation9]  }
 0x1b2   :  { %s257_s5 = sshll.u32 %s454_s4, 4  ;;  %v230_v25 = vmul.f32 1.442695, %v227_v5  ;;  %s258_s5 = int_to_ptr.vmem [resolvable:$true] %s257_s5 }
 0x202   :  { %v205_v6 = vpop.permute.xlu2 %204 }
 0x203   :  { %v212_v7 = vsub.f32 %v173_v54, %v205_v6  ;;  %v213_v8 = vsub.f32 %v187_v55, %v205_v6 }
 0x205   :  { %v216_v9 = vmul.f32 1.442695, %v212_v7  ;;  %v218_v10 = vmul.f32 1.442695, %v213_v8 }
 0x207   :  { %331 = vpow2.f32 %v216_v9 }
 0x208   :  { %333 = vpow2.f32 %v218_v10 }
 0x20a   :  { %v210_v11 = vpop.permute.xlu2 %209 }
 0x20b   :  { %v214_v12 = vsub.f32 %v175_v57, %v210_v11  ;;  %v215_v13 = vsub.f32 %v189_v58, %v210_v11 }
 0x20d   :  { %v332_v14 = vpop.eup %331  ;;  %v220_v15 = vmul.f32 1.442695, %v214_v12  ;;  %v222_v16 = vmul.f32 1.442695, %v215_v13 }
 0x20e   :  { %v334_v17 = vpop.eup %333 }
 0x20f   :  { %335 = vpow2.f32 %v220_v15  ;;  %v234_v18 = vadd.f32 %v334_v17, %v332_v14  ;;  %v249_v19 = vpack.c.bf16 %v334_v17, %v332_v14 }
 0x210   :  { %337 = vpow2.f32 %v222_v16 }
 0x211   :  { %235 = vadd.xlane.f32.xlu0 %v234_v18  ;;  %251 = vst [vmem:[#allocation9] sm:$0xff] %v249_v19  ;;  %339 = vpow2.f32 %v228_v24 }
 0x212   :  { %341 = vpow2.f32 %v230_v25 }
 0x215   :  { %v336_v20 = vpop.eup %335 }
 0x216   :  { %v338_v21 = vpop.eup %337 }
 0x217   :  { %v237_v22 = vadd.f32 %v338_v21, %v336_v20  ;;  %v250_v23 = vpack.c.bf16 %v338_v21, %v336_v20  ;;  %v340_v26 = vpop.eup %339 }
 0x218   :  { %v232_v28 = vmul.f32 %v340_v26, %v224_v27  ;;  %v342_v31 = vpop.eup %341 }
 0x219   :  { %238 = vadd.xlane.f32.xlu1 %v237_v22  ;;  %252 = vst [vmem:[#allocation9 + $0x8] sm:$0xff] %v250_v23  ;;  %v233_v33 = vmul.f32 %v342_v31, %v225_v32 }
 0x21a   :  { %265 = dma.vmem_to_hbm [thread:$0]  %s258_s5, 256, %s260_s10, [#allocation5], %s447_s7, %s447_s7, %s448_s8  }
 0x284   :  { %v236_v29 = vpop.xlane.xlu0 %235 }
 0x285   :  { %v240_v30 = vadd.f32 %v236_v29, %v232_v28 }
 0x287   :  { %243 = vst.msk [vmem:[%s578_s6] sm:$0xff] %vm124_vm9, %v240_v30 }
 0x28c   :  { %v239_v34 = vpop.xlane.xlu1 %238 }
 0x28d   :  { %v241_v35 = vadd.f32 %v239_v34, %v233_v33 }
 0x28f   :  { %244 = vst.msk [vmem:[%s578_s6 + $0x8] sm:$0xff] %vm124_vm9, %v241_v35 }
 0x290   :  { %443 = dma.done.wait [#allocation5], 256  }
 0x291   :  { %444 = vsyncadd [#allocation5], 4294967040 }
 0x292   :  { %282 = vsyncpa [#allocation4], 1 }
 0x293   :  { %283 = vsyncpa [#allocation7], 1 }
 0x294   :  { %284 = vsyncpa [#allocation5], 1 }

</bundles_post_ra>
